<compile_context>
chip_gen: v6e
topology: v6e:2x2x1
jax: 0.10.0
libtpu: 0.0.40
codegen_flags: <defaults>
</compile_context>

<pallas_src>
from functools import partial

import jax
import jax.numpy as jnp
from jax.experimental import pallas as pl
from jax.experimental.pallas import tpu as pltpu


_VMEM_CAP = 48 << 20  # never request more scoped VMEM than this (v7x-safe)


def _group_norm_kernel(x_ref, w_ref, b_ref, o_ref, *, eps, cg, s):
    """One grid step: R = k*G rows, each row is one full (Cg*S) group.

    x_ref : (R, Cg*S)  activation rows (lane-dense)
    w_ref : (R, Cg)    per-row, per-channel scale (f32)
    b_ref : (R, Cg)    per-row, per-channel shift (f32)
    """
    x = x_ref[...].astype(jnp.float32)                      # (R, Cg*S)
    inv_n = 1.0 / x.shape[-1]

    mean = jnp.sum(x, axis=-1, keepdims=True) * inv_n        # (R, 1)
    # Two-pass variance: tile is VMEM-resident, extra pass is free and avoids
    # the catastrophic cancellation of E[x^2] - mean^2.
    var = jnp.sum(jnp.square(x - mean), axis=-1, keepdims=True) * inv_n
    inv = jax.lax.rsqrt(var + eps)                           # (R, 1)

    w = w_ref[...]                                           # (R, Cg) f32
    b = b_ref[...]                                           # (R, Cg) f32

    # Per-channel chunks of S lanes: the affine is a lane broadcast of the
    # (R, 1) weight/bias columns -- no (R, Cg*S) weight/bias/scale temps.
    for c in range(cg):
        lo, hi = c * s, (c + 1) * s
        xn = (x[:, lo:hi] - mean) * inv
        o_ref[:, lo:hi] = (xn * w[:, c:c + 1] + b[:, c:c + 1]).astype(o_ref.dtype)


def _vmem_needed(R, CgS, Cg, itemsize):
    """Conservative VMEM model: double-buffered in/out blocks + f32 temps."""
    block = R * CgS * itemsize
    f32_tile = R * CgS * 4
    affine = 8 * R * Cg * 4
    return 4 * block + 2 * f32_tile + affine + (1 << 20)


def _pick_batches_per_block(N, G, CgS, Cg, itemsize, max_block_bytes):
    """Pick k = batch elements per block (R = k*G rows).

    Returns None if even a single batch element's groups exceed the VMEM
    budget (caller falls back to plain JAX).
    """
    # Legal k: block second-minor dim (k*G) % 8 == 0, or block covers all rows.
    legal = [k for k in range(1, N + 1) if ((k * G) % 8 == 0) or (k == N)]
    fitting = [k for k in legal
               if (k * G * CgS * itemsize <= max_block_bytes
                   and _vmem_needed(k * G, CgS, Cg, itemsize) <= _VMEM_CAP)]
    if not fitting:
        kmin = min(legal)
        if _vmem_needed(kmin * G, CgS, Cg, itemsize) <= _VMEM_CAP:
            return kmin
        return None  # huge-row case: caller falls back

    def nb(k):  # number of grid steps (cdiv over batches)
        return -(-N // k)

    cands = fitting
    multi = [k for k in cands if nb(k) >= 2]          # enable pipelining / megacore
    if multi:
        cands = multi
        even = [k for k in cands if nb(k) % 2 == 0]   # v7x 2-TC balance
        if even:
            cands = even
    exact = [k for k in cands if N % k == 0]          # avoid wasted tail work
    if exact:
        cands = exact
    return max(cands)                                 # biggest block that fits


def _group_norm_jax(x, weight, bias, G, eps):
    """Plain-JAX fallback for groups too large for a single VMEM block."""
    # TODO(synk): chunked two-pass Pallas path for very large spatial sizes.
    N, C, H, W = x.shape
    w = weight.astype(x.dtype).astype(jnp.float32)
    b = bias.astype(x.dtype).astype(jnp.float32)
    xr = x.reshape(N, G, -1).astype(jnp.float32)
    mean = xr.mean(-1, keepdims=True)
    var = jnp.square(xr - mean).mean(-1, keepdims=True)
    xhat = ((xr - mean) * jax.lax.rsqrt(var + eps)).reshape(N, C, H, W)
    out = xhat * w[None, :, None, None] + b[None, :, None, None]
    return out.astype(x.dtype)


def group_norm(x, weight, bias, *, num_groups=32, min_channels_per_group=4,
               eps=1e-5, max_block_bytes=4 << 20):
    """Pallas GroupNorm matching the PyTorch module semantics (NCHW input)."""
    N, C, H, W = x.shape
    G = min(num_groups, C // min_channels_per_group)
    assert C % G == 0
    Cg = C // G
    S = H * W
    CgS = Cg * S
    rows = N * G
    itemsize = x.dtype.itemsize

    k = _pick_batches_per_block(N, G, CgS, Cg, itemsize, max_block_bytes)
    if k is None:
        return _group_norm_jax(x, weight, bias, G, eps)

    R = k * G
    num_blocks = -(-N // k)  # cdiv; tail block (if any) is masked by Pallas

    # Lane-dense rows layout: one group per row (flat reinterpretation).
    x_rows = x.reshape(rows, CgS)

    # Tiny per-row affine tables: (N*G, Cg) f32 (mirrors weight.to(x.dtype)).
    w32 = weight.astype(x.dtype).astype(jnp.float32).reshape(G, Cg)
    b32 = bias.astype(x.dtype).astype(jnp.float32).reshape(G, Cg)
    w_rows = jnp.broadcast_to(w32[None], (N, G, Cg)).reshape(rows, Cg)
    b_rows = jnp.broadcast_to(b32[None], (N, G, Cg)).reshape(rows, Cg)

    vmem_limit = int(min(max(_vmem_needed(R, CgS, Cg, itemsize), 32 << 20),
                         _VMEM_CAP))

    out_rows = pl.pallas_call(
        partial(_group_norm_kernel, eps=eps, cg=Cg, s=S),
        out_shape=jax.ShapeDtypeStruct((rows, CgS), x.dtype),
        grid_spec=pltpu.PrefetchScalarGridSpec(
            num_scalar_prefetch=0,
            grid=(num_blocks,),
            in_specs=[
                pl.BlockSpec((R, CgS), lambda i: (i, 0)),
                pl.BlockSpec((R, Cg), lambda i: (i, 0)),
                pl.BlockSpec((R, Cg), lambda i: (i, 0)),
            ],
            out_specs=pl.BlockSpec((R, CgS), lambda i: (i, 0)),
        ),
        compiler_params=pltpu.CompilerParams(
            dimension_semantics=("parallel",),
            vmem_limit_bytes=vmem_limit,
        ),
    )(x_rows, w_rows, b_rows)

    return out_rows.reshape(N, C, H, W)


def group_norm_ref(x, weight, bias, num_groups, eps):
    """Pure-JAX reference identical to torch.nn.functional.group_norm (f32 out)."""
    N, C, H, W = x.shape
    w = weight.astype(x.dtype).astype(jnp.float32)
    b = bias.astype(x.dtype).astype(jnp.float32)
    xr = x.reshape(N, num_groups, -1).astype(jnp.float32)
    mean = xr.mean(axis=-1, keepdims=True)
    var = jnp.square(xr - mean).mean(axis=-1, keepdims=True)
    xhat = ((xr - mean) * jax.lax.rsqrt(var + eps)).reshape(N, C, H, W)
    return xhat * w[None, :, None, None] + b[None, :, None, None]


if __name__ == "__main__":
    key = jax.random.PRNGKey(0)
    kx, kw, kb, kx2, kw2, kb2 = jax.random.split(key, 6)

    # --- Test 1: module config num_channels=64 -> G = min(32, 64 // 4) = 16, f32.
    N, C, H, W = 2, 64, 16, 16
    eps = 1e-5
    G = min(32, C // 4)
    x = 1.5 + jax.random.normal(kx, (N, C, H, W), dtype=jnp.float32)
    weight = 1.0 + 0.1 * jax.random.normal(kw, (C,), dtype=jnp.float32)
    bias = 0.1 * jax.random.normal(kb, (C,), dtype=jnp.float32)

    out = group_norm(x, weight, bias, num_groups=32, min_channels_per_group=4, eps=eps)
    out = jax.block_until_ready(out)
    ref = group_norm_ref(x, weight, bias, G, eps)
    assert out.shape == (N, C, H, W)
    assert out.dtype == x.dtype
    err = float(jnp.max(jnp.abs(out.astype(jnp.float32) - ref)))
    assert jnp.allclose(out.astype(jnp.float32), ref, atol=1e-4, rtol=1e-4), err

    # --- Test 2: bf16 input, batch that does not divide the block count
    # (exercises the cdiv grid + masked tail block path).
    N2, C2, H2, W2 = 3, 32, 16, 16
    G2 = min(32, C2 // 4)
    x2 = 2.0 + jax.random.normal(kx2, (N2, C2, H2, W2), dtype=jnp.bfloat16)
    weight2 = 1.0 + 0.1 * jax.random.normal(kw2, (C2,), dtype=jnp.float32)
    bias2 = 0.1 * jax.random.normal(kb2, (C2,), dtype=jnp.float32)

    out2 = group_norm(x2, weight2, bias2, num_groups=32, min_channels_per_group=4, eps=eps)
    out2 = jax.block_until_ready(out2)
    ref2 = group_norm_ref(x2, weight2, bias2, G2, eps)
    assert out2.shape == (N2, C2, H2, W2)
    assert out2.dtype == x2.dtype
    err2 = float(jnp.max(jnp.abs(out2.astype(jnp.float32) - ref2)))
    assert jnp.allclose(out2.astype(jnp.float32), ref2, atol=8e-2, rtol=5e-2), err2

    print("KERNEL_OK")
</pallas_src>

<mosaic_0001>
module attributes {stable_mosaic.version = 11 : i64} {
  func.func @_group_norm_kernel(%arg0: i32, %arg1: memref<16x1024xf32, #tpu.memory_space<vmem>>, %arg2: memref<16x4xf32, #tpu.memory_space<vmem>>, %arg3: memref<16x4xf32, #tpu.memory_space<vmem>>, %arg4: memref<16x1024xf32, #tpu.memory_space<vmem>>) attributes {dimension_semantics = [#tpu.dimension_semantics<parallel>], iteration_bounds = array<i64: 2>, scalar_prefetch = 0 : i64, scratch_operands = 0 : i64, tpu.core_type = #tpu.core_type<tc>, window_params = [{transform_indices = @transform_0, window_bounds = array<i64: 16, 1024>}, {transform_indices = @transform_1, window_bounds = array<i64: 16, 4>}, {transform_indices = @transform_2, window_bounds = array<i64: 16, 4>}, {transform_indices = @transform_3, window_bounds = array<i64: 16, 1024>}]} {
    %c0 = arith.constant 0 : index
    %c0_0 = arith.constant 0 : index
    %0 = vector.load %arg1[%c0, %c0_0] : memref<16x1024xf32, #tpu.memory_space<vmem>>, vector<16x1024xf32>
    %cst = arith.constant dense<0.000000e+00> : vector<16xf32>
    %1 = vector.multi_reduction <add>, %0, %cst [1] : vector<16x1024xf32> to vector<16xf32>
    %2 = vector.shape_cast %1 : vector<16xf32> to vector<16x1xf32>
    %cst_1 = arith.constant 9.765625E-4 : f32
    %3 = vector.broadcast %cst_1 : f32 to vector<16x1xf32>
    %4 = arith.mulf %2, %3 : vector<16x1xf32>
    %5 = vector.broadcast %4 : vector<16x1xf32> to vector<16x1024xf32>
    %6 = arith.subf %0, %5 : vector<16x1024xf32>
    %7 = arith.mulf %6, %6 : vector<16x1024xf32>
    %cst_2 = arith.constant dense<0.000000e+00> : vector<16xf32>
    %8 = vector.multi_reduction <add>, %7, %cst_2 [1] : vector<16x1024xf32> to vector<16xf32>
    %9 = vector.shape_cast %8 : vector<16xf32> to vector<16x1xf32>
    %cst_3 = arith.constant 9.765625E-4 : f32
    %10 = vector.broadcast %cst_3 : f32 to vector<16x1xf32>
    %11 = arith.mulf %9, %10 : vector<16x1xf32>
    %cst_4 = arith.constant 9.99999974E-6 : f32
    %12 = vector.broadcast %cst_4 : f32 to vector<16x1xf32>
    %13 = arith.addf %11, %12 : vector<16x1xf32>
    %14 = math.rsqrt %13 : vector<16x1xf32>
    %c0_5 = arith.constant 0 : index
    %c0_6 = arith.constant 0 : index
    %15 = vector.load %arg2[%c0_5, %c0_6] : memref<16x4xf32, #tpu.memory_space<vmem>>, vector<16x4xf32>
    %c0_7 = arith.constant 0 : index
    %c0_8 = arith.constant 0 : index
    %16 = vector.load %arg3[%c0_7, %c0_8] : memref<16x4xf32, #tpu.memory_space<vmem>>, vector<16x4xf32>
    %17 = vector.extract_strided_slice %0 {offsets = [0, 0], sizes = [16, 256], strides = [1, 1]} : vector<16x1024xf32> to vector<16x256xf32>
    %18 = vector.broadcast %4 : vector<16x1xf32> to vector<16x256xf32>
    %19 = arith.subf %17, %18 : vector<16x256xf32>
    %20 = vector.broadcast %14 : vector<16x1xf32> to vector<16x256xf32>
    %21 = arith.mulf %19, %20 : vector<16x256xf32>
    %22 = vector.extract_strided_slice %15 {offsets = [0, 0], sizes = [16, 1], strides = [1, 1]} : vector<16x4xf32> to vector<16x1xf32>
    %23 = vector.broadcast %22 : vector<16x1xf32> to vector<16x256xf32>
    %24 = arith.mulf %21, %23 : vector<16x256xf32>
    %25 = vector.extract_strided_slice %16 {offsets = [0, 0], sizes = [16, 1], strides = [1, 1]} : vector<16x4xf32> to vector<16x1xf32>
    %26 = vector.broadcast %25 : vector<16x1xf32> to vector<16x256xf32>
    %27 = arith.addf %24, %26 : vector<16x256xf32>
    %c0_9 = arith.constant 0 : index
    %c0_10 = arith.constant 0 : index
    %28 = vector.load %arg4[%c0_9, %c0_10] : memref<16x1024xf32, #tpu.memory_space<vmem>>, vector<16x256xf32>
    tpu.vector_store %arg4[%c0_9, %c0_10], %27 {strides = array<i32>} : memref<16x1024xf32, #tpu.memory_space<vmem>>, vector<16x256xf32>,
    %29 = vector.extract_strided_slice %0 {offsets = [0, 256], sizes = [16, 256], strides = [1, 1]} : vector<16x1024xf32> to vector<16x256xf32>
    %30 = vector.broadcast %4 : vector<16x1xf32> to vector<16x256xf32>
    %31 = arith.subf %29, %30 : vector<16x256xf32>
    %32 = vector.broadcast %14 : vector<16x1xf32> to vector<16x256xf32>
    %33 = arith.mulf %31, %32 : vector<16x256xf32>
    %34 = vector.extract_strided_slice %15 {offsets = [0, 1], sizes = [16, 1], strides = [1, 1]} : vector<16x4xf32> to vector<16x1xf32>
    %35 = vector.broadcast %34 : vector<16x1xf32> to vector<16x256xf32>
    %36 = arith.mulf %33, %35 : vector<16x256xf32>
    %37 = vector.extract_strided_slice %16 {offsets = [0, 1], sizes = [16, 1], strides = [1, 1]} : vector<16x4xf32> to vector<16x1xf32>
    %38 = vector.broadcast %37 : vector<16x1xf32> to vector<16x256xf32>
    %39 = arith.addf %36, %38 : vector<16x256xf32>
    %c0_11 = arith.constant 0 : index
    %c256 = arith.constant 256 : index
    %40 = vector.load %arg4[%c0_11, %c256] : memref<16x1024xf32, #tpu.memory_space<vmem>>, vector<16x256xf32>
    tpu.vector_store %arg4[%c0_11, %c256], %39 {strides = array<i32>} : memref<16x1024xf32, #tpu.memory_space<vmem>>, vector<16x256xf32>,
    %41 = vector.extract_strided_slice %0 {offsets = [0, 512], sizes = [16, 256], strides = [1, 1]} : vector<16x1024xf32> to vector<16x256xf32>
    %42 = vector.broadcast %4 : vector<16x1xf32> to vector<16x256xf32>
    %43 = arith.subf %41, %42 : vector<16x256xf32>
    %44 = vector.broadcast %14 : vector<16x1xf32> to vector<16x256xf32>
    %45 = arith.mulf %43, %44 : vector<16x256xf32>
    %46 = vector.extract_strided_slice %15 {offsets = [0, 2], sizes = [16, 1], strides = [1, 1]} : vector<16x4xf32> to vector<16x1xf32>
    %47 = vector.broadcast %46 : vector<16x1xf32> to vector<16x256xf32>
    %48 = arith.mulf %45, %47 : vector<16x256xf32>
    %49 = vector.extract_strided_slice %16 {offsets = [0, 2], sizes = [16, 1], strides = [1, 1]} : vector<16x4xf32> to vector<16x1xf32>
    %50 = vector.broadcast %49 : vector<16x1xf32> to vector<16x256xf32>
    %51 = arith.addf %48, %50 : vector<16x256xf32>
    %c0_12 = arith.constant 0 : index
    %c512 = arith.constant 512 : index
    %52 = vector.load %arg4[%c0_12, %c512] : memref<16x1024xf32, #tpu.memory_space<vmem>>, vector<16x256xf32>
    tpu.vector_store %arg4[%c0_12, %c512], %51 {strides = array<i32>} : memref<16x1024xf32, #tpu.memory_space<vmem>>, vector<16x256xf32>,
    %53 = vector.extract_strided_slice %0 {offsets = [0, 768], sizes = [16, 256], strides = [1, 1]} : vector<16x1024xf32> to vector<16x256xf32>
    %54 = vector.broadcast %4 : vector<16x1xf32> to vector<16x256xf32>
    %55 = arith.subf %53, %54 : vector<16x256xf32>
    %56 = vector.broadcast %14 : vector<16x1xf32> to vector<16x256xf32>
    %57 = arith.mulf %55, %56 : vector<16x256xf32>
    %58 = vector.extract_strided_slice %15 {offsets = [0, 3], sizes = [16, 1], strides = [1, 1]} : vector<16x4xf32> to vector<16x1xf32>
    %59 = vector.broadcast %58 : vector<16x1xf32> to vector<16x256xf32>
    %60 = arith.mulf %57, %59 : vector<16x256xf32>
    %61 = vector.extract_strided_slice %16 {offsets = [0, 3], sizes = [16, 1], strides = [1, 1]} : vector<16x4xf32> to vector<16x1xf32>
    %62 = vector.broadcast %61 : vector<16x1xf32> to vector<16x256xf32>
    %63 = arith.addf %60, %62 : vector<16x256xf32>
    %c0_13 = arith.constant 0 : index
    %c768 = arith.constant 768 : index
    %64 = vector.load %arg4[%c0_13, %c768] : memref<16x1024xf32, #tpu.memory_space<vmem>>, vector<16x256xf32>
    tpu.vector_store %arg4[%c0_13, %c768], %63 {strides = array<i32>} : memref<16x1024xf32, #tpu.memory_space<vmem>>, vector<16x256xf32>,
    return
  }
  func.func @transform_0(%arg0: i32) -> (i32, i32) {
    %c0_i32 = arith.constant 0 : i32
    %c0_i32_0 = arith.constant 0 : i32
    return %arg0, %c0_i32 : i32, i32
  }
  func.func @transform_1(%arg0: i32) -> (i32, i32) {
    %c0_i32 = arith.constant 0 : i32
    %c0_i32_0 = arith.constant 0 : i32
    return %arg0, %c0_i32 : i32, i32
  }
  func.func @transform_2(%arg0: i32) -> (i32, i32) {
    %c0_i32 = arith.constant 0 : i32
    %c0_i32_0 = arith.constant 0 : i32
    return %arg0, %c0_i32 : i32, i32
  }
  func.func @transform_3(%arg0: i32) -> (i32, i32) {
    %c0_i32 = arith.constant 0 : i32
    %c0_i32_0 = arith.constant 0 : i32
    return %arg0, %c0_i32 : i32, i32
  }
}

</mosaic_0001>

<bundles_post_ra>
// kernel: tpu_custom_call.1
= control target key start
LH: loop header
LB: loop body
LE: loop exit
PB: predicated region body
PF: predicated region fallthrough
CT: control target
= control target key end

     0   :  { %8 = vsyncpa [#allocation3], 0  ;;  %s1148_s0 = inlined_call_operand.hbm [shape: f32[32,1024], index: 0, kind: input, shape index: {}]   ;;  %s1149_s1 = inlined_call_operand.vmem [shape: f32[32,4], index: 1, kind: input, shape index: {}]   ;;  %s1150_s2 = inlined_call_operand.vmem [shape: f32[32,4], index: 2, kind: input, shape index: {}]   ;;  %s1151_s3 = inlined_call_operand.hbm [shape: f32[32,1024], index: 3, kind: output, shape index: {}]  }
   0x1   :  { %10 = vsyncpa [#allocation3 + $0x1], 0 }
   0x2   :  { %11 = vsyncpa [#allocation4], 0 }
   0x3   :  { %13 = vsyncpa [#allocation4 + $0x1], 0  ;;  %s793_s12 = smov 0   ;;  %s795_s13 = smov 0  }
   0x4   :  { %s797_s14 = smov 0   ;;  %s799_s15 = smov 0  }
   0x5 LB: > { %s814_s16 = sadd.s32 4294967295, %s761_s15   ;;  %s576_s17 = sadd.s32 4294967294, %s761_s15   ;;  %s761_s15 = sphi %s799_s15, %s1166_s15   ;;  %s757_s14 = sphi %s797_s14, %s1165_s14   ;;  %s753_s13 = sphi %s795_s13, %s1164_s13   ;;  %s749_s12 = sphi %s793_s12, %s1163_s12  }
   0x6   : > { %s818_s18 = sadd.s32 1, %s761_s15   ;;  %s26_s19 = sadd.s32 1, %s757_s14 }
   0x7   : > { %s23_s20 = ssub.s32 %s761_s15, %s818_s18  ;;  %p33_p0 = scmp.ne.s32.totalorder %s757_s14, %s753_s13 }
   0x8   : > { %p24_p1 = scmp.eq.s32.totalorder %s23_s20, 0  ;;  %p34_p2 = scmp.eq.s32.totalorder %s761_s15, 0 }
   0x9   : > { %p39_p3 = scmp.ne.s32.totalorder %s753_s13, %s749_s12  ;;  %p40_p4 = scmp.eq.s32.totalorder %s814_s16, 0 }
   0xa   : > { %s830_s21 = scalar_select %p24_p1, %s757_s14, %s26_s19  }
   0xb   : > { %p832_p5 = por %p34_p2, %p33_p0  ;;  %p836_p6 = por %p40_p4, %p39_p3 }
   0xc   : > { %p115_p7 = scmp.eq.s32.totalorder %s814_s16, 1  ;;  %p121_p8 = scmp.eq.s32.totalorder %s576_s17, 1 }
   0xd   : > { %s1155_s23 = scalar_select %p836_p6, 1, 0 }
   0xe   : > { %p612_p10 = scmp.lt.s32.totalorder %s761_s15, 2  ;;  %p843_p11 = por %p115_p7, %p33_p0 }
   0xf   : > { %p847_p12 = por %p121_p8, %p39_p3  ;;  %s141_s26 = sand.u32 1, %s757_s14  }
  0x10   : > { %s1156_s24 = scalar_select %p843_p11, 1, 0 }
  0x11   : > { %s1157_s25 = scalar_select %p847_p12, 1, 0 }
  0x12   : > { %s597_s27 = sshll.u32 %s761_s15, 11  ;;  %s579_s28 = sshll.u32 %s141_s26, 7 }
  0x13   : > { %s856_s4 = scalar_lea.hbm %s1148_s0, %s597_s27  ;;  %s145_s5 = scalar_lea.vmem [#allocation2], %s579_s28 }
  0x14   : > { %s153_s6 = sshll.u32 %s145_s5, 4  ;;  %p860_p13 = pnand %p612_p10, %p832_p5  ;;  %s864_s6 = int_to_ptr.vmem [resolvable:$true] %s153_s6 }
  0x15   : > { %s866_s8 = scalar_lea.sflag [#allocation3], %s141_s26  ;;  %s669_s9 = scalar_lea.hbm %s856_s4, 2048 }
  0x16   : > { %p670_p0 = scmp.ne.s32.totalorder %s856_s4, %s669_s9  ;;  %p671_p1 = pneg %p860_p13 }
  0x17   : > { %s674_s17 = scalar_lea.hbm %s1148_s0, 4096  ;;  %p675_p4 = scmp.lt.s32.totalorder %s856_s4, %s1148_s0 }
  0x18   : > { %p672_p2 = pnand %p671_p1, %p670_p0  ;;  %p676_p5 = scmp.lt.s32.totalorder %s674_s17, %s669_s9 }
  0x1a   : > { %p673_p3 = pneg %p672_p2  ;;  %p677_p7 = por %p676_p5, %p675_p4 }
  0x1c   : > { %p678_p8 = pnand %p677_p7, %p673_p3 }
  0x1e   : > { %681 = shalt.err (!%p678_p8)
}
  0x1f   : > { %s682_s22 = scalar_lea.vmem %s864_s6, 2048  ;;  %s763_s26 = smov [#allocation2]  }
  0x20   : > { %p683_p10 = scmp.ne.s32.totalorder %s864_s6, %s682_s22  ;;  %s687_s27 = sshll.u32 %s763_s26, 4  ;;  %s688_s27 = int_to_ptr.vmem [resolvable:$false] %s687_s27 }
  0x21   : > { %s689_s28 = scalar_lea.vmem %s688_s27, 4096  ;;  %p690_p2 = scmp.lt.s32.totalorder %s864_s6, %s688_s27 }
  0x22   : > { %p685_p9 = pnand %p683_p10, %p671_p1  ;;  %p691_p12 = scmp.lt.s32.totalorder %s689_s28, %s682_s22 }
  0x24   : > { %p686_p0 = pneg %p685_p9  ;;  %p692_p11 = por %p691_p12, %p690_p2 }
  0x26   : > { %p693_p6 = pnand %p692_p11, %p686_p0 }
  0x28   : > { %696 = shalt.err (!%p693_p6)
}
  0x29   : > { %s764_s29 = smov 1024   ;;  %s765_s30 = smov 64  }
  0x2a   : > { %607 = dma.hbm_to_vmem [thread:$0]  (!%p860_p13), %s856_s4, 2048, %s864_s6, %s866_s8, %s764_s29, %s764_s29, %s765_s30  }
  0x2b   : > { %p583_p9 = scmp.ge.s32.totalorder %s761_s15, 1  ;;  %p179_p1 = scmp.lt.s32.totalorder %s761_s15, 3 }
  0x2d   : > { %p180_p3 = pnand %p583_p9, %p179_p1 }
  0x2e   : > { %s890_s5 = sand.u32 (!%p180_p3), 1, %s753_s13   ;;  %p1159_p6 = scmp.ne.s32.totalorder (!%p180_p3), %s1155_s23, 0 }
  0x2f   : > { %183 = sbr.rel (%p180_p3) target bundleno = 411 (0x19b), region = 32  ;;  %s584_s9 = sshll.u32 (!%p180_p3), %s890_s5, 7 }
  0x30   : > { %s186_s10 = scalar_lea.sflag (!%p180_p3), [#allocation3], %s890_s5  ;;  %s896_s11 = scalar_lea.vmem (!%p180_p3), [#allocation2], %s584_s9 }
  0x34   : > { %740 = dma.done.wait (%p1159_p6), %s186_s10, 2048  }
  0x35   : > { %742 = vsyncadd (%p1159_p6), %s186_s10, 4294965248  ;;  %s586_s4 = sshll.u32 %s814_s16, 1  ;;  %v766_v0 = vmov 0   ;;  %v907_v1 = vld [vmem:[%s896_s11] sm:$0xff]  ;;  %v910_v2 = vld [vmem:[%s896_s11 + $0x8] sm:$0xff]  ;;  %v767_v26 = vmov 1  }
  0x36   : > { %655 = vset.pattern.permute.xlu1 %v766_v0  ;;  %p224_p11 = scmp.lt.s32.totalorder %s586_s4, 3  ;;  %654 = vset.pattern.permute.xlu0 %v766_v0  ;;  %v913_v3 = vld [vmem:[%s896_s11 + $0x10] sm:$0xff]  ;;  %v252_v4 = vadd.f32 %v910_v2, %v907_v1  ;;  %v918_v5 = vld [vmem:[%s896_s11 + $0x18] sm:$0xff]  ;;  %v921_v6 = vld [vmem:[%s896_s11 + $0x40] sm:$0xff]  ;;  %v768_v34 = vmov 2   ;;  %v769_v35 = vmov 3  }
  0x37   : > { %v930_v8 = vld [vmem:[%s896_s11 + $0x48] sm:$0xff]  ;;  %v933_v9 = vld [vmem:[%s896_s11 + $0x50] sm:$0xff]  ;;  %v936_v10 = vld [vmem:[%s896_s11 + $0x20] sm:$0xff]  ;;  %s1070_s22 = scalar_lea.vmem [#allocation5], %s584_s9  ;;  %s599_s26 = sshll.u32 %s814_s16, 11 }
  0x38   : > { %s1168_s4 = smov (!%p224_p11, %s586_s4), 3  ;;  %v253_v7 = vadd.f32 %v252_v4, %v913_v3  ;;  %v261_v11 = vadd.f32 %v930_v8, %v921_v6  ;;  %v942_v13 = vld [vmem:[%s896_s11 + $0x58] sm:$0xff]  ;;  %v945_v15 = vld [vmem:[%s896_s11 + $0x28] sm:$0xff]  ;;  %v950_v18 = vld [vmem:[%s896_s11 + $0x60] sm:$0xff]  ;;  %s479_s27 = sshll.u32 %s1070_s22, 4  ;;  %s1097_s27 = int_to_ptr.vmem [resolvable:$true] %s479_s27 }
  0x39   : > { %s587_s23 = sshll.u32 %s1168_s4, 3  ;;  %v953_v19 = vld [vmem:[%s896_s11 + $0x30] sm:$0xff]  ;;  %v958_v23 = vld [vmem:[%s896_s11 + $0x68] sm:$0xff]  ;;  %v961_v24 = vld [vmem:[%s896_s11 + $0x38] sm:$0xff]  ;;  %s1095_s29 = scalar_lea.hbm %s1151_s3, %s599_s26 }
  0x3a   : > { %s227_s8 = scalar_lea.vmem %s1149_s1, %s587_s23  ;;  %v254_v12 = vadd.f32 %v253_v7, %v918_v5  ;;  %v262_v16 = vadd.f32 %v261_v11, %v933_v9  ;;  %v966_v28 = vld [vmem:[%s896_s11 + $0x70] sm:$0xff]  ;;  %v971_v31 = vld [vmem:[%s896_s11 + $0x78] sm:$0xff]  ;;  %s233_s20 = scalar_lea.vmem %s1150_s2, %s587_s23 }
  0x3b   : > { %v329_v14 = vld [vmem:[%s227_s8 + $0x8] sm:$0xff]  ;;  %v328_v21 = vld [vmem:[%s227_s8] sm:$0xff]  ;;  %s465_s30 = scalar_lea.sflag [#allocation4], %s890_s5  ;;  %s697_s9 = scalar_lea.vmem %s1097_s27, 2048 }
  0x3c   : > { %343 = vperm.xlu1 %655, %v329_v14   ;;  %v255_v17 = vadd.f32 %v254_v12, %v936_v10  ;;  %v263_v20 = vadd.f32 %v262_v16, %v942_v13  ;;  %v330_v36 = vld [vmem:[%s233_s20] sm:$0xff]  ;;  %v331_v37 = vld [vmem:[%s233_s20 + $0x8] sm:$0xff]  ;;  %p698_p12 = scmp.ne.s32.totalorder %s1097_s27, %s697_s9  ;;  %p1160_p13 = scmp.ne.s32.totalorder %s1156_s24, 0 }
  0x3d   : > { %s770_s10 = smov [#allocation5]  }
  0x3e   : > { %v256_v22 = vadd.f32 %v255_v17, %v945_v15  ;;  %v264_v25 = vadd.f32 %v263_v20, %v950_v18  ;;  %p699_p4 = pnand %p698_p12, %p1160_p13  ;;  %s701_s11 = sshll.u32 %s770_s10, 4  ;;  %s702_s11 = int_to_ptr.vmem [resolvable:$false] %s701_s11 }
  0x3f   : > { %s703_s4 = scalar_lea.vmem %s702_s11, 4096  ;;  %p704_p7 = scmp.lt.s32.totalorder %s1097_s27, %s702_s11 }
  0x40   : > { %656 = vset.pattern.permute.xlu1 %v767_v26  ;;  %v257_v27 = vadd.f32 %v256_v22, %v953_v19  ;;  %v265_v29 = vadd.f32 %v264_v25, %v958_v23  ;;  %p700_p5 = pneg %p699_p4  ;;  %p705_p8 = scmp.lt.s32.totalorder %s703_s4, %s697_s9 }
  0x41   : > { %373 = vperm.xlu1 %656, %v328_v21  }
  0x42   : > { %v258_v30 = vadd.f32 %v257_v27, %v961_v24  ;;  %v266_v32 = vadd.f32 %v265_v29, %v966_v28  ;;  %p706_p10 = por %p705_p8, %p704_p7 }
  0x44   : > { %259 = vadd.xlane.f32.xlu0 %v258_v30  ;;  %v267_v33 = vadd.f32 %v266_v32, %v971_v31  ;;  %p707_p0 = pnand %p706_p10, %p700_p5 }
  0x45   : > { %377 = vperm.xlu1 %656, %v329_v14  }
  0x48   : > { %268 = vadd.xlane.f32.xlu0 %v267_v33 }
  0x49   : > { %657 = vset.pattern.permute.xlu1 %v768_v34 }
  0x4a   : > { %405 = vperm.xlu1 %657, %v328_v21  }
  0x4e   : > { %409 = vperm.xlu1 %657, %v329_v14  }
  0x52   : > { %658 = vset.pattern.permute.xlu1 %v769_v35 }
  0x53   : > { %437 = vperm.xlu1 %658, %v328_v21  }
  0x57   : > { %441 = vperm.xlu1 %658, %v329_v14  }
  0x5b   : > { %659 = vset.pattern.permute.xlu1 %v766_v0 }
  0x5c   : > { %352 = vperm.xlu1 %659, %v330_v36  }
  0x5e   : > { %338 = vperm.xlu0 %654, %v328_v21  }
  0x60   : > { %660 = vset.pattern.permute.xlu1 %v767_v26 }
  0x61   : > { %385 = vperm.xlu1 %660, %v330_v36  }
  0x62   : > { %357 = vperm.xlu0 %654, %v331_v37  }
  0x65   : > { %662 = vset.pattern.permute.xlu1 %v768_v34 }
  0x66   : > { %417 = vperm.xlu1 %662, %v330_v36   ;;  %661 = vset.pattern.permute.xlu0 %v767_v26 }
  0x67   : > { %389 = vperm.xlu0 %661, %v331_v37  }
  0x6a   : > { %421 = vperm.xlu1 %662, %v331_v37  }
  0x6b   : > { %663 = vset.pattern.permute.xlu0 %v769_v35 }
  0x6c   : > { %449 = vperm.xlu0 %663, %v330_v36  }
  0x6e   : > { %664 = vset.pattern.permute.xlu1 %v769_v35 }
  0xcd   : > { %v260_v38 = vpop.xlane.xlu0 %259 }
  0xce   : > { %v270_v39 = vmul.f32 0.0009765625, %v260_v38 }
  0xd0   : > { %v981_v40 = vsub.f32 %v907_v1, %v270_v39  ;;  %v984_v41 = vsub.f32 %v910_v2, %v270_v39  ;;  %v987_v42 = vsub.f32 %v913_v3, %v270_v39  ;;  %v990_v45 = vsub.f32 %v918_v5, %v270_v39 }
  0xd1   : > { %v269_v43 = vpop.xlane.xlu0 %268  ;;  %v997_v48 = vsub.f32 %v936_v10, %v270_v39  ;;  %v1011_v54 = vsub.f32 %v945_v15, %v270_v39  ;;  %v278_v60 = vsub.f32 %v953_v19, %v270_v39  ;;  %v279_v2 = vsub.f32 %v961_v24, %v270_v39  ;;  %v344_v24 = vpop.permute.xlu1 %343 }
  0xd2   : > { %v271_v44 = vmul.f32 0.0009765625, %v269_v43  ;;  %v288_v46 = vmul.f32 %v981_v40, %v981_v40  ;;  %v289_v47 = vmul.f32 %v984_v41, %v984_v41  ;;  %v290_v49 = vmul.f32 %v987_v42, %v987_v42 }
  0xd3   : > { %v291_v55 = vmul.f32 %v990_v45, %v990_v45  ;;  %v292_v61 = vmul.f32 %v997_v48, %v997_v48  ;;  %v293_v3 = vmul.f32 %v1011_v54, %v1011_v54 }
  0xd4   : > { %v304_v50 = vadd.f32 %v289_v47, %v288_v46  ;;  %v1002_v51 = vsub.f32 %v921_v6, %v271_v44  ;;  %v1005_v52 = vsub.f32 %v930_v8, %v271_v44  ;;  %v1008_v53 = vsub.f32 %v933_v9, %v271_v44 }
  0xd5   : > { %v1018_v58 = vsub.f32 %v942_v13, %v271_v44  ;;  %v1026_v63 = vsub.f32 %v950_v18, %v271_v44  ;;  %v1034_v5 = vsub.f32 %v958_v23, %v271_v44  ;;  %v294_v8 = vmul.f32 %v278_v60, %v278_v60  ;;  %v374_v25 = vpop.permute.xlu1 %373 }
  0xd6   : > { %v305_v56 = vadd.f32 %v304_v50, %v290_v49  ;;  %v296_v57 = vmul.f32 %v1002_v51, %v1002_v51  ;;  %v297_v59 = vmul.f32 %v1005_v52, %v1005_v52  ;;  %v298_v0 = vmul.f32 %v1008_v53, %v1008_v53 }
  0xd7   : > { %v299_v6 = vmul.f32 %v1018_v58, %v1018_v58  ;;  %v1039_v10 = vsub.f32 %v966_v28, %v271_v44  ;;  %v300_v11 = vmul.f32 %v1026_v63, %v1026_v63  ;;  %v295_v13 = vmul.f32 %v279_v2, %v279_v2 }
  0xd8   : > { %v306_v62 = vadd.f32 %v305_v56, %v291_v55  ;;  %v313_v1 = vadd.f32 %v297_v59, %v296_v57  ;;  %v1044_v15 = vsub.f32 %v971_v31, %v271_v44  ;;  %v301_v16 = vmul.f32 %v1034_v5, %v1034_v5 }
  0xd9   : > { %v302_v19 = vmul.f32 %v1039_v10, %v1039_v10  ;;  %v378_v26 = vpop.permute.xlu1 %377  ;;  %v339_v39 = vpop.permute.xlu0 %338 }
  0xda   : > { %v307_v4 = vadd.f32 %v306_v62, %v292_v61  ;;  %v314_v7 = vadd.f32 %v313_v1, %v298_v0  ;;  %v303_v21 = vmul.f32 %v1044_v15, %v1044_v15 }
  0xdc   : > { %v308_v9 = vadd.f32 %v307_v4, %v293_v3  ;;  %v315_v12 = vadd.f32 %v314_v7, %v299_v6 }
  0xdd   : > { %v406_v27 = vpop.permute.xlu1 %405  ;;  %v358_v46 = vpop.permute.xlu0 %357 }
  0xde   : > { %v309_v14 = vadd.f32 %v308_v9, %v294_v8  ;;  %v316_v17 = vadd.f32 %v315_v12, %v300_v11 }
  0xe0   : > { %v310_v18 = vadd.f32 %v309_v14, %v295_v13  ;;  %v317_v20 = vadd.f32 %v316_v17, %v301_v16 }
  0xe1   : > { %v1052_v28 = vpop.permute.xlu1 %409 }
  0xe2   : > { %311 = vadd.xlane.f32.xlu1 %v310_v18  ;;  %v318_v22 = vadd.f32 %v317_v20, %v302_v19  ;;  %v390_v47 = vpop.permute.xlu0 %389 }
  0xe4   : > { %v319_v23 = vadd.f32 %v318_v22, %v303_v21 }
  0xe5   : > { %v438_v29 = vpop.permute.xlu1 %437 }
  0xe6   : > { %320 = vadd.xlane.f32.xlu1 %v319_v23 }
  0xe7   : > { %v450_v59 = vpop.permute.xlu0 %449 }
  0xe9   : > { %v442_v30 = vpop.permute.xlu1 %441 }
  0xed   : > { %v353_v31 = vpop.permute.xlu1 %352 }
  0xf1   : > { %v386_v32 = vpop.permute.xlu1 %385 }
  0xf5   : > { %v1054_v33 = vpop.permute.xlu1 %417 }
  0xf7   : > { %453 = vperm.xlu1 %664, %v331_v37  }
  0xf9   : > { %v1056_v34 = vpop.permute.xlu1 %421 }
 0x16b   : > { %v312_v35 = vpop.xlane.xlu1 %311 }
 0x16c   : > { %v322_v36 = vmul.f32 0.0009765625, %v312_v35 }
 0x16e   : > { %v324_v38 = vadd.f32 1e-05, %v322_v36 }
 0x16f   : > { %v321_v37 = vpop.xlane.xlu1 %320 }
 0x170   : > { %665 = vrsqrt.f32 %v324_v38  ;;  %v323_v43 = vmul.f32 0.0009765625, %v321_v37 }
 0x172   : > { %v325_v44 = vadd.f32 1e-05, %v323_v43 }
 0x173   : > { %v454_v19 = vpop.permute.xlu1 %453 }
 0x174   : > { %667 = vrsqrt.f32 %v325_v44 }
 0x17d   : > { %v666_v49 = vpop.eup %665 }
 0x17e   : > { %v332_v50 = vmul.f32 %v666_v49, %v981_v40  ;;  %v333_v55 = vmul.f32 %v666_v49, %v984_v41  ;;  %v432_v56 = vmul.f32 %v666_v49, %v278_v60  ;;  %v433_v57 = vmul.f32 %v666_v49, %v279_v2 }
 0x17f   : > { %v368_v61 = vmul.f32 %v666_v49, %v987_v42  ;;  %v369_v62 = vmul.f32 %v666_v49, %v990_v45  ;;  %v400_v0 = vmul.f32 %v666_v49, %v997_v48  ;;  %v401_v1 = vmul.f32 %v666_v49, %v1011_v54 }
 0x180   : > { %v346_v3 = vmul.f32 %v339_v39, %v332_v50  ;;  %v347_v4 = vmul.f32 %v339_v39, %v333_v55  ;;  %v444_v6 = vmul.f32 %v438_v29, %v432_v56  ;;  %v445_v7 = vmul.f32 %v438_v29, %v433_v57 }
 0x181   : > { %v380_v8 = vmul.f32 %v374_v25, %v368_v61  ;;  %v381_v40 = vmul.f32 %v374_v25, %v369_v62  ;;  %v412_v9 = vmul.f32 %v406_v27, %v400_v0  ;;  %v413_v41 = vmul.f32 %v406_v27, %v401_v1  ;;  %v668_v60 = vpop.eup %667 }
 0x182   : > { %v360_v2 = vadd.f32 %v353_v31, %v346_v3  ;;  %v361_v11 = vadd.f32 %v353_v31, %v347_v4  ;;  %v456_v12 = vadd.f32 %v450_v59, %v444_v6  ;;  %v457_v42 = vadd.f32 %v450_v59, %v445_v7 }
 0x183   : > { %v334_v45 = vmul.f32 %v668_v60, %v1002_v51  ;;  %v335_v48 = vmul.f32 %v668_v60, %v1005_v52  ;;  %v370_v54 = vmul.f32 %v668_v60, %v1008_v53  ;;  %v371_v13 = vmul.f32 %v668_v60, %v1018_v58 }
 0x184   : > { %364 = vst [vmem:[%s1070_s22] sm:$0xff] %v360_v2  ;;  %365 = vst [vmem:[%s1070_s22 + $0x8] sm:$0xff] %v361_v11  ;;  %v434_v51 = vmul.f32 %v668_v60, %v1039_v10  ;;  %v435_v52 = vmul.f32 %v668_v60, %v1044_v15  ;;  %v392_v53 = vadd.f32 %v386_v32, %v380_v8 }
 0x185   : > { %460 = vst [vmem:[%s1070_s22 + $0x30] sm:$0xff] %v456_v12  ;;  %461 = vst [vmem:[%s1070_s22 + $0x38] sm:$0xff] %v457_v42  ;;  %v393_v58 = vadd.f32 %v386_v32, %v381_v40  ;;  %v348_v14 = vmul.f32 %v344_v24, %v334_v45  ;;  %v349_v16 = vmul.f32 %v344_v24, %v335_v48 }
 0x186   : > { %v382_v17 = vmul.f32 %v378_v26, %v370_v54  ;;  %v383_v18 = vmul.f32 %v378_v26, %v371_v13  ;;  %v446_v20 = vmul.f32 %v442_v30, %v434_v51  ;;  %v447_v21 = vmul.f32 %v442_v30, %v435_v52  ;;  %396 = vst [vmem:[%s1070_s22 + $0x10] sm:$0xff] %v392_v53 }
 0x187   : > { %397 = vst [vmem:[%s1070_s22 + $0x18] sm:$0xff] %v393_v58  ;;  %v402_v10 = vmul.f32 %v668_v60, %v1026_v63  ;;  %v403_v22 = vmul.f32 %v668_v60, %v1034_v5  ;;  %v362_v15 = vadd.f32 %v358_v46, %v348_v14  ;;  %v363_v23 = vadd.f32 %v358_v46, %v349_v16 }
 0x188   : > { %v394_v24 = vadd.f32 %v390_v47, %v382_v17  ;;  %v395_v25 = vadd.f32 %v390_v47, %v383_v18  ;;  %v458_v26 = vadd.f32 %v454_v19, %v446_v20  ;;  %v459_v27 = vadd.f32 %v454_v19, %v447_v21 }
 0x189   : > { %v414_v29 = vmul.f32 %v1052_v28, %v402_v10  ;;  %v415_v30 = vmul.f32 %v1052_v28, %v403_v22  ;;  %366 = vst [vmem:[%s1070_s22 + $0x40] sm:$0xff] %v362_v15  ;;  %367 = vst [vmem:[%s1070_s22 + $0x48] sm:$0xff] %v363_v23  ;;  %v424_v63 = vadd.f32 %v1054_v33, %v412_v9 }
 0x18a   : > { %398 = vst [vmem:[%s1070_s22 + $0x50] sm:$0xff] %v394_v24  ;;  %399 = vst [vmem:[%s1070_s22 + $0x58] sm:$0xff] %v395_v25  ;;  %v425_v5 = vadd.f32 %v1054_v33, %v413_v41 }
 0x18b   : > { %462 = vst [vmem:[%s1070_s22 + $0x70] sm:$0xff] %v458_v26  ;;  %463 = vst [vmem:[%s1070_s22 + $0x78] sm:$0xff] %v459_v27  ;;  %v426_v28 = vadd.f32 %v1056_v34, %v414_v29  ;;  %v427_v31 = vadd.f32 %v1056_v34, %v415_v30 }
 0x18c   : > { %428 = vst [vmem:[%s1070_s22 + $0x20] sm:$0xff] %v424_v63  ;;  %429 = vst [vmem:[%s1070_s22 + $0x28] sm:$0xff] %v425_v5 }
 0x18d   : > { %430 = vst [vmem:[%s1070_s22 + $0x60] sm:$0xff] %v426_v28  ;;  %431 = vst [vmem:[%s1070_s22 + $0x68] sm:$0xff] %v427_v31 }
 0x18e   : > { %710 = shalt.err (!%p707_p0)
}
 0x18f   : > { %s711_s23 = scalar_lea.hbm %s1095_s29, 2048  ;;  %s715_s8 = scalar_lea.hbm %s1151_s3, 4096 }
 0x190   : > { %p712_p2 = scmp.ne.s32.totalorder %s1095_s29, %s711_s23  ;;  %p716_p3 = scmp.lt.s32.totalorder %s1095_s29, %s1151_s3 }
 0x191   : > { %p717_p6 = scmp.lt.s32.totalorder %s715_s8, %s711_s23 }
 0x192   : > { %p713_p9 = pnand %p712_p2, %p1160_p13 }
 0x193   : > { %p718_p11 = por %p717_p6, %p716_p3 }
 0x194   : > { %p714_p1 = pneg %p713_p9 }
 0x196   : > { %p719_p12 = pnand %p718_p11, %p714_p1 }
 0x198   : > { %722 = shalt.err (!%p719_p12)
}
 0x199   : > { %s771_s20 = smov 1024   ;;  %s772_s22 = smov 64  }
 0x19a   : > { %602 = dma.vmem_to_hbm [thread:$0]  (%p1160_p13), %s1097_s27, 2048, %s1095_s29, %s465_s30, %s771_s20, %s771_s20, %s772_s22  }
 0x19b PF: > { %s494_s26 = sand.u32 1, %s749_s12   ;;  %p1161_p4 = scmp.ne.s32.totalorder %s1157_s25, 0 }
 0x19c   : > { %p1162_p5 = scmp.ge.s32.totalorder %s761_s15, 2  ;;  %s495_s16 = scalar_lea.sflag [#allocation4], %s494_s26 }
 0x19e   : > { %p609_p7 = pnand %p1162_p5, %p1161_p4 }
 0x1a0   : > { %p610_p8 = pneg %p609_p7 }
 0x1a2   : > { %744 = dma.done.wait (%p610_p8), %s495_s16, 2048  }
 0x1a3   : > { %746 = vsyncadd (%p610_p8), %s495_s16, 4294965248  ;;  %p16_p10 = scmp.ge.s32.totalorder %s818_s18, 4   ;;  %s1163_s12 = smov %s753_s13 }
 0x1a4   : > { %s1164_s13 = smov %s757_s14  ;;  %s1165_s14 = smov %s830_s21 }
 0x1a5   : > { %s1166_s15 = smov %s818_s18  ;;  %18 = sbr.rel (!%p16_p10) target bundleno = 5 (0x5), region = 83 }
 0x1aa   :  { %500 = vsyncpa [#allocation3], 1 }
 0x1ab   :  { %502 = vsyncpa [#allocation3 + $0x1], 1 }
 0x1ac   :  { %503 = vsyncpa [#allocation4], 1 }
 0x1ad   :  { %505 = vsyncpa [#allocation4 + $0x1], 1 }

</bundles_post_ra>
